<compile_context>
chip_gen: v5e
topology: v5e:2x2
jax: 0.10.0
libtpu: 0.0.40
codegen_flags: <defaults>
</compile_context>

<pallas_src>
import jax
import jax.numpy as jnp
from jax.experimental import pallas as pl
from jax.experimental.pallas import tpu as pltpu


def _round_up(n: int, m: int) -> int:
    return ((n + m - 1) // m) * m


# -----------------------------------------------------------------------------
# Kernel
# -----------------------------------------------------------------------------
def qnetwork_kernel(x_ref, p_ref, b2_ref, o_ref):
    """One batch tile of fc1 -> leaky_relu -> fc2.

    x_ref : [TB, in_pad]         VMEM, tiled over the batch grid axis
    p_ref : [in_pad + 16, H_pad] VMEM, resident: W1 rows | b1 row | w2 row
    b2_ref: [1, 1]               SMEM scalar
    o_ref : [1, TB]              VMEM, batch on lanes -> lane-dense store
    """
    in_pad = x_ref.shape[1]

    w1 = p_ref[0:in_pad, :]                # [in_pad, H_pad]
    b1 = p_ref[in_pad:in_pad + 1, :]       # [1, H_pad]
    w2 = p_ref[in_pad + 8:in_pad + 9, :]   # [1, H_pad]

    # fc1 on the MXU, f32 accumulation.
    h = jnp.dot(x_ref[...], w1, preferred_element_type=jnp.float32) + b1
    # leaky_relu (PyTorch default negative_slope = 0.01).
    h = jnp.where(h > 0.0, h, 0.01 * h)

    # fc2: VPU multiply + XLU transpose + cross-sublane sum instead of an
    # N=1 MXU matmul. Result has batch on lanes -> unmasked, lane-dense store.
    prod = h * w2                                   # [TB, H_pad]   (VPU)
    q = jnp.sum(prod.T, axis=0, keepdims=True)      # [1, TB]       (XLU)
    o_ref[...] = q + b2_ref[0, 0]


# -----------------------------------------------------------------------------
# Wrapper
# -----------------------------------------------------------------------------
_MAX_BATCH_TILE = 512  # rows per grid step; multiple of 128 so the lane-dense
                       # output block stays (8,128)-legal when B is tiled.


@jax.jit
def qnetwork_forward(x, packed, b2):
    """x: [B, in_dim] f32, packed: [in_pad+16, H_pad], b2: [1,1] -> [B, 1]."""
    B, in_dim = x.shape
    in_pad = packed.shape[0] - 16
    h_pad = packed.shape[1]

    if B <= _MAX_BATCH_TILE:
        tb = _round_up(max(B, 1), 8)
        b_pad = tb
    else:
        tb = _MAX_BATCH_TILE
        b_pad = _round_up(B, tb)

    if (b_pad, in_pad) != (B, in_dim):
        x = jnp.pad(x, ((0, b_pad - B), (0, in_pad - in_dim)))

    grid = (b_pad // tb,)

    q_row = pl.pallas_call(
        qnetwork_kernel,
        out_shape=jax.ShapeDtypeStruct((1, b_pad), jnp.float32),
        grid_spec=pltpu.PrefetchScalarGridSpec(
            num_scalar_prefetch=0,
            grid=grid,
            in_specs=[
                # Activations: tiled over the batch axis.
                pl.BlockSpec((tb, in_pad), lambda i: (i, 0)),
                # Packed weights: constant index_map -> stays VMEM resident.
                pl.BlockSpec((in_pad + 16, h_pad), lambda i: (0, 0)),
                # fc2 bias: scalar in SMEM.
                pl.BlockSpec(memory_space=pltpu.MemorySpace.SMEM),
            ],
            out_specs=pl.BlockSpec((1, tb), lambda i: (0, i)),
        ),
        compiler_params=pltpu.CompilerParams(
            dimension_semantics=("parallel",),   # v7x: both TCs split batch
            vmem_limit_bytes=32 * 1024 * 1024,   # explicit budget; fits v7x
        ),
    )(x, packed, b2)

    return q_row[0, :B].reshape(B, 1)


# -----------------------------------------------------------------------------
# Parameter init (mimics the PyTorch module) and one-time packing
# -----------------------------------------------------------------------------
def init_qnetwork_params(key, state_dim, action_dim, hidden_size):
    """kaiming_normal weights (gain=sqrt(2), fan_in), default Linear bias init.
    Weights are returned in [in, out] layout (transposed vs. PyTorch)."""
    in_dim = state_dim + action_dim
    k1, k2, k3, k4 = jax.random.split(key, 4)

    std1 = (2.0 / in_dim) ** 0.5
    w1 = std1 * jax.random.normal(k1, (in_dim, hidden_size), dtype=jnp.float32)
    bnd1 = 1.0 / (in_dim ** 0.5)
    b1 = jax.random.uniform(k2, (1, hidden_size), minval=-bnd1, maxval=bnd1,
                            dtype=jnp.float32)

    std2 = (2.0 / hidden_size) ** 0.5
    w2 = std2 * jax.random.normal(k3, (hidden_size, 1), dtype=jnp.float32)
    bnd2 = 1.0 / (hidden_size ** 0.5)
    b2 = jax.random.uniform(k4, (1, 1), minval=-bnd2, maxval=bnd2,
                            dtype=jnp.float32)
    return w1, b1, w2, b2


def pack_qnetwork_params(w1, b1, w2, b2):
    """Pack (and zero-pad) parameters once, outside the per-call hot path.

    Packed layout, shape [in_pad + 16, H_pad]:
      rows [0, in_dim)   : W1 ([in, out] layout, zero-padded)
      row  in_pad        : b1
      row  in_pad + 8    : w2 (the [hidden, 1] column, stored as a row)
    """
    in_dim, hidden = w1.shape
    in_pad = _round_up(in_dim, 8)
    h_pad = _round_up(hidden, 128)

    packed = jnp.zeros((in_pad + 16, h_pad), dtype=jnp.float32)
    packed = packed.at[:in_dim, :hidden].set(w1)
    packed = packed.at[in_pad, :hidden].set(b1[0])
    packed = packed.at[in_pad + 8, :hidden].set(w2[:, 0])
    return packed, b2.astype(jnp.float32)


def qnetwork_reference(x, w1, b1, w2, b2):
    """Pure-JAX reference for correctness checking."""
    h = x @ w1 + b1
    h = jnp.where(h > 0, h, 0.01 * h)
    return h @ w2 + b2


# -----------------------------------------------------------------------------
# Demo / self-test
# -----------------------------------------------------------------------------
if __name__ == "__main__":
    state_dim, action_dim, hidden_size = 12, 4, 32

    key = jax.random.PRNGKey(0)
    kx_small, kx_big, kp = jax.random.split(key, 3)

    w1, b1, w2, b2 = init_qnetwork_params(kp, state_dim, action_dim, hidden_size)
    packed, b2s = pack_qnetwork_params(w1, b1, w2, b2)

    # Small batch: single tile, every block equals the full array shape.
    x_small = jax.random.normal(kx_small, (8, state_dim + action_dim),
                                dtype=jnp.float32)
    out_small = jax.block_until_ready(qnetwork_forward(x_small, packed, b2s))
    ref_small = qnetwork_reference(x_small, w1, b1, w2, b2)
    assert out_small.shape == (8, 1), out_small.shape
    assert jnp.allclose(out_small, ref_small, atol=1e-4, rtol=1e-5), \
        "small-batch mismatch vs reference"

    # Larger, non-multiple batch: exercises the batch grid (2 tiles of 512),
    # resident weights, padding, and the "parallel" batch axis.
    x_big = jax.random.normal(kx_big, (1000, state_dim + action_dim),
                              dtype=jnp.float32)
    out_big = jax.block_until_ready(qnetwork_forward(x_big, packed, b2s))
    ref_big = qnetwork_reference(x_big, w1, b1, w2, b2)
    assert out_big.shape == (1000, 1), out_big.shape
    assert jnp.allclose(out_big, ref_big, atol=1e-4, rtol=1e-5), \
        "big-batch mismatch vs reference"

    print("KERNEL_OK")
</pallas_src>

<mosaic_0001>
module attributes {stable_mosaic.version = 11 : i64} {
  func.func @qnetwork_kernel(%arg0: i32, %arg1: memref<8x16xf32, #tpu.memory_space<vmem>>, %arg2: memref<32x128xf32, #tpu.memory_space<vmem>>, %arg3: memref<1x1xf32, #tpu.memory_space<smem>>, %arg4: memref<1x8xf32, #tpu.memory_space<vmem>>) attributes {dimension_semantics = [#tpu.dimension_semantics<parallel>], iteration_bounds = array<i64: 1>, scalar_prefetch = 0 : i64, scratch_operands = 0 : i64, tpu.core_type = #tpu.core_type<tc>, window_params = [{transform_indices = @transform_0, window_bounds = array<i64: 8, 16>}, {pipeline_mode = #tpu.pipeline_mode<synchronous>, transform_indices = @transform_1, window_bounds = array<i64: 32, 128>}, {transform_indices = @transform_2, window_bounds = array<i64: 1, 1>}, {transform_indices = @transform_3, window_bounds = array<i64: 1, 8>}]} {
    %c0 = arith.constant 0 : index
    %c0_0 = arith.constant 0 : index
    %0 = vector.load %arg2[%c0, %c0_0] : memref<32x128xf32, #tpu.memory_space<vmem>>, vector<16x128xf32>
    %c16 = arith.constant 16 : index
    %c0_1 = arith.constant 0 : index
    %1 = vector.load %arg2[%c16, %c0_1] : memref<32x128xf32, #tpu.memory_space<vmem>>, vector<1x128xf32>
    %c24 = arith.constant 24 : index
    %c0_2 = arith.constant 0 : index
    %2 = vector.load %arg2[%c24, %c0_2] : memref<32x128xf32, #tpu.memory_space<vmem>>, vector<1x128xf32>
    %c0_3 = arith.constant 0 : index
    %c0_4 = arith.constant 0 : index
    %3 = vector.load %arg1[%c0_3, %c0_4] : memref<8x16xf32, #tpu.memory_space<vmem>>, vector<8x16xf32>
    %cst = arith.constant dense<0.000000e+00> : vector<8x128xf32>
    %4 = tpu.matmul %3, %0, %cst {dimension_numbers = #tpu.dot_dimension_numbers<[1], [0], [0], [1], [0, 0, 1, 1], [], []>} : vector<8x16xf32>, vector<16x128xf32>, vector<8x128xf32> -> vector<8x128xf32>
    %5 = vector.broadcast %1 : vector<1x128xf32> to vector<8x128xf32>
    %6 = arith.addf %4, %5 : vector<8x128xf32>
    %cst_5 = arith.constant 0.000000e+00 : f32
    %7 = vector.broadcast %cst_5 : f32 to vector<8x128xf32>
    %8 = arith.cmpf ogt, %6, %7 : vector<8x128xf32>
    %cst_6 = arith.constant 0.00999999977 : f32
    %9 = vector.broadcast %cst_6 : f32 to vector<8x128xf32>
    %10 = arith.mulf %9, %6 : vector<8x128xf32>
    %11 = arith.select %8, %6, %10 : vector<8x128xi1>, vector<8x128xf32>
    %12 = vector.broadcast %2 : vector<1x128xf32> to vector<8x128xf32>
    %13 = arith.mulf %11, %12 : vector<8x128xf32>
    %14 = tpu.transpose %13, [1, 0] : vector<8x128xf32> -> vector<128x8xf32>
    %cst_7 = arith.constant dense<0.000000e+00> : vector<8xf32>
    %15 = vector.multi_reduction <add>, %14, %cst_7 [0] : vector<128x8xf32> to vector<8xf32>
    %16 = vector.shape_cast %15 : vector<8xf32> to vector<1x8xf32>
    %c0_8 = arith.constant 0 : index
    %c0_9 = arith.constant 0 : index
    %17 = memref.load %arg3[%c0_8, %c0_9] : memref<1x1xf32, #tpu.memory_space<smem>>
    %18 = vector.broadcast %17 : f32 to vector<1x8xf32>
    %19 = arith.addf %16, %18 : vector<1x8xf32>
    %c0_10 = arith.constant 0 : index
    %c0_11 = arith.constant 0 : index
    %20 = vector.load %arg4[%c0_10, %c0_11] : memref<1x8xf32, #tpu.memory_space<vmem>>, vector<1x8xf32>
    tpu.vector_store %arg4[%c0_10, %c0_11], %19 {strides = array<i32>} : memref<1x8xf32, #tpu.memory_space<vmem>>, vector<1x8xf32>,
    return
  }
  func.func @transform_0(%arg0: i32) -> (i32, i32) {
    %c0_i32 = arith.constant 0 : i32
    %c0_i32_0 = arith.constant 0 : i32
    return %arg0, %c0_i32 : i32, i32
  }
  func.func @transform_1(%arg0: i32) -> (i32, i32) {
    %c0_i32 = arith.constant 0 : i32
    %c0_i32_0 = arith.constant 0 : i32
    %c0_i32_1 = arith.constant 0 : i32
    return %c0_i32, %c0_i32_0 : i32, i32
  }
  func.func @transform_2(%arg0: i32) -> (i32, i32) {
    %c0_i32 = arith.constant 0 : i32
    %c0_i32_0 = arith.constant 0 : i32
    %c0_i32_1 = arith.constant 0 : i32
    return %c0_i32, %c0_i32_0 : i32, i32
  }
  func.func @transform_3(%arg0: i32) -> (i32, i32) {
    %c0_i32 = arith.constant 0 : i32
    %c0_i32_0 = arith.constant 0 : i32
    return %c0_i32, %arg0 : i32, i32
  }
}

</mosaic_0001>

<bundles_post_ra>
// kernel: qnetwork_forward.1
= control target key start
LH: loop header
LB: loop body
LE: loop exit
PB: predicated region body
PF: predicated region fallthrough
CT: control target
= control target key end

     0   :  { %9 = vsyncpa [#allocation4], 0  ;;  %s314_s0 = inlined_call_operand.hbm [shape: f32[8,16], index: 0, kind: input, shape index: {}]   ;;  %s315_s1 = inlined_call_operand.hbm [shape: f32[32,128], index: 1, kind: input, shape index: {}]   ;;  %s316_s2 = inlined_call_operand.<no memory space> [shape: f32[1,1], index: 2, kind: input, shape index: {}]   ;;  %s317_s3 = inlined_call_operand.hbm [shape: f32[1,8], index: 3, kind: output, shape index: {}]  }
   0x1   :  { %10 = vsyncpa [#allocation7], 0 }
   0x2   :  { %11 = vsyncpa [#allocation5], 0  ;;  %s17_s14 = sshll.u32 %s314_s0, 4  ;;  %s261_s15 = smov [#allocation3]   ;;  %s18_s14 = int_to_ptr.hbm [resolvable:$true] %s17_s14 }
   0x3   :  { %s19_s16 = sshll.u32 %s261_s15, 4  ;;  %s27_s19 = sshll.u32 %s315_s1, 4  ;;  %s20_s16 = int_to_ptr.vmem [resolvable:$true] %s19_s16  ;;  %s28_s19 = int_to_ptr.hbm [resolvable:$true] %s27_s19 }
   0x4   :  { %22 = dma.hbm_to_vmem [thread:$0]  %s18_s14, 128, %s20_s16, [#allocation4]  }
   0x5   :  { %s262_s20 = smov [#allocation6]   ;;  %s263_s22 = smov 128  }
   0x6   :  { %s29_s21 = sshll.u32 %s262_s20, 4  ;;  %s264_s23 = smov 8   ;;  %s30_s21 = int_to_ptr.vmem [resolvable:$true] %s29_s21 }
   0x7   :  { %35 = dma.hbm_to_vmem [thread:$0]  %s28_s19, 512, %s30_s21, [#allocation7], %s263_s22, %s263_s22, %s264_s23  }
   0x8   :  { %255 = dma.done.wait [#allocation4], 128  }
   0x9   :  { %256 = vsyncadd [#allocation4], 4294967168 }
   0xa   :  { %257 = dma.done.wait [#allocation7], 512  }
   0xb   :  { %258 = vsyncadd [#allocation7], 4294966784  ;;  %v47_v0 = vld [vmem:[#allocation6 + $0x8] sm:$0xff]  ;;  %v46_v1 = vld [vmem:[#allocation6] sm:$0xff]  ;;  %vm52_vm0 = vcmask 130048   ;;  %vm113_vm2 = vcmask 64512   ;;  %v152_v62 = vstv %s316_s2 }
   0xc   :  { %70 = vmatpush.msra.mxu0 %v47_v0  ;;  %v50_v2 = vld [vmem:[#allocation3] sm:$0xff]  ;;  %v181_v3 = vld [vmem:[#allocation6 + $0x10] ss:$0 sm:$0xff]  ;;  %s265_s24 = smov [#allocation8]   ;;  %s163_s28 = sshll.u32 %s317_s3, 4  ;;  %vm154_vm3 = vcmask 57344   ;;  %s164_s28 = int_to_ptr.hbm [resolvable:$true] %s163_s28 }
   0xd   :  { %v182_v6 = vld [vmem:[#allocation6 + $0x18] ss:$0 sm:$0xff]  ;;  %s161_s25 = sshll.u32 %s265_s24, 4  ;;  %s162_s25 = int_to_ptr.vmem [resolvable:$true] %s161_s25 }
   0xe   :  { %71 = vmatpush.msra.mxu0 %v46_v1 }
   0xf   :  { %174 = vmatmul.msk.f32.vlgmr.msra.gmra.mxu0 %vm52_vm0, %v50_v2 }
  0x8c   :  { %v73_v4 = vpop.f32.mrf.mxu0 }
  0x8d   :  { %v74_v5 = vadd.f32 %v181_v3, %v73_v4 }
  0x8f   :  { %v77_v7 = vmul.f32 0.01, %v74_v5  ;;  %vm76_vm1 = vcmp.gt.f32.partialorder %v74_v5, 0.0 }
  0x91   :  { %v78_v8 = vsel %vm76_vm1, %v74_v5, %v77_v7 }
  0x92   :  { %v80_v9 = vmul.f32 %v182_v6, %v78_v8 }
  0x94   :  { %81 = vxpose.xlu0.b32.start.end [1/1] (short) %v80_v9, 128 }
 0x138   :  { %v97_v10 = vpop.trf.xlu0 }
 0x139   :  { %v114_v12 = vsel %vm113_vm2, %v97_v10, 0.0 }
 0x140   :  { %v98_v11 = vpop.trf.xlu0 }
 0x141   :  { %v115_v13 = vsel %vm113_vm2, %v98_v11, 0.0 }
 0x142   :  { %v116_v14 = vadd.f32 %v115_v13, %v114_v12 }
 0x148   :  { %v99_v15 = vpop.trf.xlu0 }
 0x149   :  { %v117_v16 = vsel %vm113_vm2, %v99_v15, 0.0 }
 0x14a   :  { %v118_v17 = vadd.f32 %v117_v16, %v116_v14 }
 0x150   :  { %v100_v18 = vpop.trf.xlu0 }
 0x151   :  { %v119_v19 = vsel %vm113_vm2, %v100_v18, 0.0 }
 0x152   :  { %v120_v20 = vadd.f32 %v119_v19, %v118_v17 }
 0x158   :  { %v101_v21 = vpop.trf.xlu0 }
 0x159   :  { %v121_v22 = vsel %vm113_vm2, %v101_v21, 0.0 }
 0x15a   :  { %v122_v23 = vadd.f32 %v121_v22, %v120_v20 }
 0x160   :  { %v102_v24 = vpop.trf.xlu0 }
 0x161   :  { %v123_v32 = vsel %vm113_vm2, %v102_v24, 0.0 }
 0x162   :  { %v124_v34 = vadd.f32 %v123_v32, %v122_v23 }
 0x168   :  { %v103_v25 = vpop.trf.xlu0 }
 0x169   :  { %v125_v33 = vsel %vm113_vm2, %v103_v25, 0.0 }
 0x16a   :  { %v126_v36 = vadd.f32 %v125_v33, %v124_v34 }
 0x170   :  { %v104_v26 = vpop.trf.xlu0 }
 0x171   :  { %v127_v35 = vsel %vm113_vm2, %v104_v26, 0.0 }
 0x172   :  { %v128_v39 = vadd.f32 %v127_v35, %v126_v36 }
 0x178   :  { %v105_v27 = vpop.trf.xlu0 }
 0x179   :  { %v129_v38 = vsel %vm113_vm2, %v105_v27, 0.0 }
 0x17a   :  { %v130_v41 = vadd.f32 %v129_v38, %v128_v39 }
 0x180   :  { %v106_v28 = vpop.trf.xlu0 }
 0x181   :  { %v131_v40 = vsel %vm113_vm2, %v106_v28, 0.0 }
 0x182   :  { %v132_v43 = vadd.f32 %v131_v40, %v130_v41 }
 0x188   :  { %v107_v29 = vpop.trf.xlu0 }
 0x189   :  { %v133_v42 = vsel %vm113_vm2, %v107_v29, 0.0 }
 0x18a   :  { %v134_v45 = vadd.f32 %v133_v42, %v132_v43 }
 0x190   :  { %v108_v30 = vpop.trf.xlu0 }
 0x191   :  { %v135_v44 = vsel %vm113_vm2, %v108_v30, 0.0 }
 0x192   :  { %v136_v48 = vadd.f32 %v135_v44, %v134_v45 }
 0x198   :  { %v109_v31 = vpop.trf.xlu0 }
 0x199   :  { %v137_v47 = vsel %vm113_vm2, %v109_v31, 0.0 }
 0x19a   :  { %v138_v50 = vadd.f32 %v137_v47, %v136_v48 }
 0x1a0   :  { %v110_v37 = vpop.trf.xlu0 }
 0x1a1   :  { %v139_v49 = vsel %vm113_vm2, %v110_v37, 0.0 }
 0x1a2   :  { %v140_v52 = vadd.f32 %v139_v49, %v138_v50 }
 0x1a8   :  { %v111_v46 = vpop.trf.xlu0 }
 0x1a9   :  { %v141_v51 = vsel %vm113_vm2, %v111_v46, 0.0 }
 0x1aa   :  { %v142_v53 = vadd.f32 %v141_v51, %v140_v52 }
 0x1b0   :  { %v112_v54 = vpop.trf.xlu0 }
 0x1b1   :  { %v143_v55 = vsel %vm113_vm2, %v112_v54, 0.0 }
 0x1b2   :  { %v144_v56 = vadd.f32 %v143_v55, %v142_v53 }
 0x1b4   :  { %v145_v57 = vrot.slane %v144_v56, 4 }
 0x1b6   :  { %v146_v58 = vadd.f32 %v145_v57, %v144_v56 }
 0x1b8   :  { %v147_v59 = vrot.slane %v146_v58, 2 }
 0x1ba   :  { %v148_v60 = vadd.f32 %v147_v59, %v146_v58 }
 0x1bc   :  { %v149_v61 = vrot.slane %v148_v60, 1 }
 0x1be   :  { %v150_v63 = vadd.f32 %v149_v61, %v148_v60 }
 0x1c0   :  { %v153_v0 = vadd.f32 %v152_v62, %v150_v63 }
 0x1c2   :  { %155 = vst.msk [vmem:[#allocation8] sm:$0x1] %vm154_vm3, %v153_v0 }
 0x1c3   :  { %166 = dma.vmem_to_hbm [thread:$0]  %s162_s25, 16, %s164_s28, [#allocation5]  }
 0x1c4   :  { %259 = dma.done.wait [#allocation5], 16  }
 0x1c5   :  { %260 = vsyncadd [#allocation5], 4294967280 }
 0x1c6   :  { %171 = vsyncpa [#allocation4], 1 }
 0x1c7   :  { %172 = vsyncpa [#allocation7], 1 }
 0x1c8   :  { %173 = vsyncpa [#allocation5], 1 }

</bundles_post_ra>
